<compile_context>
chip_gen: v7x
topology: tpu7x:2x2x1
jax: 0.10.0
libtpu: 0.0.40
codegen_flags: <defaults>
</compile_context>

<pallas_src>
import functools

import jax
import jax.numpy as jnp
from jax.experimental import pallas as pl
from jax.experimental.pallas import tpu as pltpu

BN_EPS = 1e-5


def _bn_train(y, gamma, beta):
    """Training-mode BatchNorm1d folded into one scale/shift per feature.

    One-pass stats (f32): mean = E[y], var = max(E[y^2] - E[y]^2, 0).
    """
    inv_b = jnp.float32(1.0 / y.shape[0])
    mean = jnp.sum(y, axis=0, keepdims=True) * inv_b
    mean_sq = jnp.sum(y * y, axis=0, keepdims=True) * inv_b
    var = jnp.maximum(mean_sq - mean * mean, 0.0)
    scale = gamma * jax.lax.rsqrt(var + BN_EPS)   # rsqrt -> EUP slot (cheap)
    shift = beta - mean * scale
    return y * scale + shift


def _decoder_cat_kernel(*refs, num_layers, feat_dims):
    """Whole-network fused kernel.

    refs layout:
      refs[0]                    x        (B, D0)              VMEM f32
      refs[1 .. num_layers]      w_i      (D_{i-1}, D_i)       VMEM bf16
      refs[num_layers + 1]       gb       (L, 2, Dmax)         VMEM f32
      refs[num_layers + 2]       w_last   (1, D_last)          VMEM f32
      refs[num_layers + 3]       gb_last  (2,)                 SMEM f32
      refs[num_layers + 4]       out      (B, 1)               VMEM f32
    """
    x_ref = refs[0]
    w_refs = refs[1:1 + num_layers]
    gb_ref = refs[1 + num_layers]
    wl_ref = refs[2 + num_layers]
    gbl_ref = refs[3 + num_layers]
    o_ref = refs[4 + num_layers]

    x = x_ref[...]  # (B, D0) f32

    # Hidden layers: Linear (bias-free, see header) -> BN(train) -> ReLU.
    for i in range(num_layers):
        d_out = feat_dims[i + 1]
        y = jnp.dot(x.astype(jnp.bfloat16), w_refs[i][...],
                    preferred_element_type=jnp.float32)          # MXU, f32 acc
        gb = gb_ref[i]                                           # (2, Dmax) f32
        gamma = gb[0:1, :d_out]                                  # (1, d_out)
        beta = gb[1:2, :d_out]
        x = jnp.maximum(_bn_train(y, gamma, beta), 0.0)

    # Final Linear(D_last, 1): an N=1 matmul wastes the MXU -> VPU multiply +
    # lane reduce instead.  Bias again dropped (training BN follows).
    y = jnp.sum(x * wl_ref[...], axis=-1, keepdims=True)         # (B, 1) f32
    z = _bn_train(y, gbl_ref[0], gbl_ref[1])                     # SMEM scalars
    o_ref[...] = jnp.tanh(z).astype(o_ref.dtype)


def _padded_vmem_bytes(arr):
    """Rough (8,128)-tile-padded VMEM footprint of one array."""
    shape = tuple(arr.shape)
    if len(shape) == 0:
        shape = (1, 1)
    elif len(shape) == 1:
        shape = (1,) + shape
    *lead, r, c = shape
    lead_n = 1
    for d in lead:
        lead_n *= d
    r_pad = -(-r // 8) * 8
    c_pad = -(-c // 128) * 128
    return lead_n * r_pad * c_pad * jnp.dtype(arr.dtype).itemsize


def decoder_cat_pallas(x, params):
    """Full decoder_cat forward as a single fused Pallas call.

    `params` is a list of (w, b, gamma, beta) per layer, weights stored as
    (in_features, out_features).  Linear biases are accepted but not used by
    the kernel (exactly cancelled by the training-mode BN that follows).
    """
    num_layers = len(params) - 1
    B, d0 = x.shape
    feat_dims = [d0] + [w.shape[1] for (w, _, _, _) in params[:-1]]
    d_last = feat_dims[-1]
    d_max = feat_dims[1]  # widest hidden layer

    x = x.astype(jnp.float32)

    # bf16 weights for the MXU (accumulation stays f32 inside the kernel).
    w_hidden = [w.astype(jnp.bfloat16) for (w, _, _, _) in params[:-1]]

    # Pack all hidden (gamma, beta) into one (L, 2, d_max) f32 array: one DMA
    # instead of 2*L tiny padded tiles.
    gb_rows = []
    for (_, _, gamma, beta), d in zip(params[:-1], feat_dims[1:]):
        row = jnp.stack([gamma.reshape(d), beta.reshape(d)], axis=0)   # (2, d)
        row = jnp.pad(row, ((0, 0), (0, d_max - d)))
        gb_rows.append(row)
    gb = jnp.stack(gb_rows, axis=0).astype(jnp.float32)                # (L, 2, d_max)

    w_last, _, gamma_last, beta_last = params[-1]
    w_last = w_last.reshape(1, d_last).astype(jnp.float32)             # VPU path
    gb_last = jnp.stack(
        [gamma_last.reshape(()), beta_last.reshape(())]).astype(jnp.float32)  # (2,)

    vmem = pl.BlockSpec(memory_space=pltpu.MemorySpace.VMEM)
    smem = pl.BlockSpec(memory_space=pltpu.MemorySpace.SMEM)

    flat_args = [x, *w_hidden, gb, w_last, gb_last]
    in_specs = [vmem] * (3 + num_layers) + [smem]

    out_shape = jax.ShapeDtypeStruct((B, 1), jnp.float32)

    # vmem_limit derived from actual padded bytes (+slack), capped for v7x's
    # 64 MiB VMEM; floor keeps the compiler comfortable on toy sizes.
    vmem_bytes = sum(_padded_vmem_bytes(a) for a in flat_args[:-1])  # SMEM arg excluded
    vmem_bytes += _padded_vmem_bytes(jnp.zeros((B, 1), jnp.float32))
    vmem_limit = min(max(2 * vmem_bytes + (4 << 20), 8 << 20), 48 << 20)

    kernel = functools.partial(_decoder_cat_kernel, num_layers=num_layers,
                               feat_dims=tuple(feat_dims))
    return pl.pallas_call(
        kernel,
        out_shape=out_shape,
        in_specs=in_specs,
        out_specs=vmem,
        compiler_params=pltpu.CompilerParams(vmem_limit_bytes=vmem_limit),
    )(*flat_args)


# jit once: single fused kernel, no per-layer dispatch.
decoder_cat_forward = jax.jit(decoder_cat_pallas)


def init_decoder_cat_params(key, input_size, num_layers):
    """Deterministic parameter init matching decoder_cat's shapes.

    Weights are stored transposed vs PyTorch, i.e. (in_features, out_features).
    """
    assert num_layers > 0
    assert input_size // 2 ** num_layers > 1
    params = []
    d_in = input_size
    for _ in range(num_layers):
        d_out = d_in // 2
        key, kw, kb = jax.random.split(key, 3)
        bound = 1.0 / jnp.sqrt(d_in)
        w = jax.random.uniform(kw, (d_in, d_out), jnp.float32, -bound, bound)
        b = jax.random.uniform(kb, (1, d_out), jnp.float32, -bound, bound)
        gamma = jnp.ones((1, d_out), jnp.float32)
        beta = jnp.zeros((1, d_out), jnp.float32)
        params.append((w, b, gamma, beta))
        d_in = d_out
    # last_dns: Linear(d_in, 1); last_bn: BatchNorm1d(1)
    key, kw, kb = jax.random.split(key, 3)
    bound = 1.0 / jnp.sqrt(d_in)
    w = jax.random.uniform(kw, (d_in, 1), jnp.float32, -bound, bound)
    b = jax.random.uniform(kb, (1, 1), jnp.float32, -bound, bound)
    gamma = jnp.ones((1, 1), jnp.float32)
    beta = jnp.zeros((1, 1), jnp.float32)
    params.append((w, b, gamma, beta))
    return params


def _reference_forward(x, params):
    """Pure-JAX reference with the module's exact math (bias + two-pass BN).

    Hidden matmuls use the same bf16->f32 MXU precision as the kernel so the
    comparison isolates kernel correctness from the dtype choice.
    """
    num_layers = len(params) - 1
    for i, (w, b, gamma, beta) in enumerate(params):
        if i < num_layers:
            y = jnp.dot(x.astype(jnp.bfloat16), w.astype(jnp.bfloat16),
                        preferred_element_type=jnp.float32) + b
        else:
            y = x @ w + b
        mean = jnp.mean(y, axis=0, keepdims=True)
        var = jnp.mean((y - mean) ** 2, axis=0, keepdims=True)   # biased var
        z = gamma * (y - mean) * jax.lax.rsqrt(var + BN_EPS) + beta
        x = jnp.maximum(z, 0.0) if i < num_layers else jnp.tanh(z)
    return x


if __name__ == "__main__":
    key = jax.random.PRNGKey(0)
    input_size = 32
    num_layers = 2
    batch = 8

    key, kx = jax.random.split(key)
    x = jax.random.normal(kx, (batch, input_size), jnp.float32)
    params = init_decoder_cat_params(key, input_size, num_layers)

    out = decoder_cat_forward(x, params)
    out = jax.block_until_ready(out)
    assert out.shape == (batch, 1), out.shape

    ref = _reference_forward(x, params)
    assert jnp.allclose(out, ref, rtol=1e-3, atol=1e-3), (out, ref)

    print("KERNEL_OK")
</pallas_src>

<mosaic_0001>
module attributes {stable_mosaic.version = 11 : i64} {
  func.func @_decoder_cat_kernel(%arg0: memref<8x32xf32, #tpu.memory_space<vmem>>, %arg1: memref<32x16xbf16, #tpu.memory_space<vmem>>, %arg2: memref<16x8xbf16, #tpu.memory_space<vmem>>, %arg3: memref<2x2x16xf32, #tpu.memory_space<vmem>>, %arg4: memref<1x8xf32, #tpu.memory_space<vmem>>, %arg5: memref<2xf32, #tpu.memory_space<smem>>, %arg6: memref<8x1xf32, #tpu.memory_space<vmem>>) attributes {dimension_semantics = [], scalar_prefetch = 0 : i64, scratch_operands = 0 : i64, tpu.core_type = #tpu.core_type<tc>} {
    %c0 = arith.constant 0 : index
    %c0_0 = arith.constant 0 : index
    %0 = vector.load %arg0[%c0, %c0_0] : memref<8x32xf32, #tpu.memory_space<vmem>>, vector<8x32xf32>
    %1 = arith.truncf %0 : vector<8x32xf32> to vector<8x32xbf16>
    %c0_1 = arith.constant 0 : index
    %c0_2 = arith.constant 0 : index
    %2 = vector.load %arg1[%c0_1, %c0_2] : memref<32x16xbf16, #tpu.memory_space<vmem>>, vector<32x16xbf16>
    %cst = arith.constant dense<0.000000e+00> : vector<8x16xf32>
    %3 = tpu.matmul %1, %2, %cst {dimension_numbers = #tpu.dot_dimension_numbers<[1], [0], [0], [1], [0, 0, 1, 1], [], []>} : vector<8x32xbf16>, vector<32x16xbf16>, vector<8x16xf32> -> vector<8x16xf32>
    %c0_3 = arith.constant 0 : index
    %c0_4 = arith.constant 0 : index
    %c0_5 = arith.constant 0 : index
    %4 = vector.load %arg3[%c0_3, %c0_4, %c0_5] : memref<2x2x16xf32, #tpu.memory_space<vmem>>, vector<1x2x16xf32>
    %5 = vector.shape_cast %4 : vector<1x2x16xf32> to vector<2x16xf32>
    %6 = vector.extract_strided_slice %5 {offsets = [0, 0], sizes = [1, 16], strides = [1, 1]} : vector<2x16xf32> to vector<1x16xf32>
    %7 = vector.extract_strided_slice %5 {offsets = [1, 0], sizes = [1, 16], strides = [1, 1]} : vector<2x16xf32> to vector<1x16xf32>
    %cst_6 = arith.constant dense<0.000000e+00> : vector<16xf32>
    %8 = vector.multi_reduction <add>, %3, %cst_6 [0] : vector<8x16xf32> to vector<16xf32>
    %9 = vector.shape_cast %8 : vector<16xf32> to vector<1x16xf32>
    %cst_7 = arith.constant 1.250000e-01 : f32
    %10 = vector.broadcast %cst_7 : f32 to vector<1x16xf32>
    %11 = arith.mulf %9, %10 : vector<1x16xf32>
    %12 = arith.mulf %3, %3 : vector<8x16xf32>
    %cst_8 = arith.constant dense<0.000000e+00> : vector<16xf32>
    %13 = vector.multi_reduction <add>, %12, %cst_8 [0] : vector<8x16xf32> to vector<16xf32>
    %14 = vector.shape_cast %13 : vector<16xf32> to vector<1x16xf32>
    %cst_9 = arith.constant 1.250000e-01 : f32
    %15 = vector.broadcast %cst_9 : f32 to vector<1x16xf32>
    %16 = arith.mulf %14, %15 : vector<1x16xf32>
    %17 = arith.mulf %11, %11 : vector<1x16xf32>
    %18 = arith.subf %16, %17 : vector<1x16xf32>
    %cst_10 = arith.constant 0.000000e+00 : f32
    %19 = vector.broadcast %cst_10 : f32 to vector<1x16xf32>
    %20 = arith.maximumf %18, %19 : vector<1x16xf32>
    %cst_11 = arith.constant 9.99999974E-6 : f32
    %21 = vector.broadcast %cst_11 : f32 to vector<1x16xf32>
    %22 = arith.addf %20, %21 : vector<1x16xf32>
    %23 = math.rsqrt %22 : vector<1x16xf32>
    %24 = arith.mulf %6, %23 : vector<1x16xf32>
    %25 = arith.mulf %11, %24 : vector<1x16xf32>
    %26 = arith.subf %7, %25 : vector<1x16xf32>
    %27 = vector.broadcast %24 : vector<1x16xf32> to vector<8x16xf32>
    %28 = arith.mulf %3, %27 : vector<8x16xf32>
    %29 = vector.broadcast %26 : vector<1x16xf32> to vector<8x16xf32>
    %30 = arith.addf %28, %29 : vector<8x16xf32>
    %cst_12 = arith.constant 0.000000e+00 : f32
    %31 = vector.broadcast %cst_12 : f32 to vector<8x16xf32>
    %32 = arith.maximumf %30, %31 : vector<8x16xf32>
    %33 = arith.truncf %32 : vector<8x16xf32> to vector<8x16xbf16>
    %c0_13 = arith.constant 0 : index
    %c0_14 = arith.constant 0 : index
    %34 = vector.load %arg2[%c0_13, %c0_14] : memref<16x8xbf16, #tpu.memory_space<vmem>>, vector<16x8xbf16>
    %cst_15 = arith.constant dense<0.000000e+00> : vector<8x8xf32>
    %35 = tpu.matmul %33, %34, %cst_15 {dimension_numbers = #tpu.dot_dimension_numbers<[1], [0], [0], [1], [0, 0, 1, 1], [], []>} : vector<8x16xbf16>, vector<16x8xbf16>, vector<8x8xf32> -> vector<8x8xf32>
    %c1 = arith.constant 1 : index
    %c0_16 = arith.constant 0 : index
    %c0_17 = arith.constant 0 : index
    %36 = vector.load %arg3[%c1, %c0_16, %c0_17] : memref<2x2x16xf32, #tpu.memory_space<vmem>>, vector<1x2x16xf32>
    %37 = vector.shape_cast %36 : vector<1x2x16xf32> to vector<2x16xf32>
    %38 = vector.extract_strided_slice %37 {offsets = [0, 0], sizes = [1, 8], strides = [1, 1]} : vector<2x16xf32> to vector<1x8xf32>
    %39 = vector.extract_strided_slice %37 {offsets = [1, 0], sizes = [1, 8], strides = [1, 1]} : vector<2x16xf32> to vector<1x8xf32>
    %cst_18 = arith.constant dense<0.000000e+00> : vector<8xf32>
    %40 = vector.multi_reduction <add>, %35, %cst_18 [0] : vector<8x8xf32> to vector<8xf32>
    %41 = vector.shape_cast %40 : vector<8xf32> to vector<1x8xf32>
    %cst_19 = arith.constant 1.250000e-01 : f32
    %42 = vector.broadcast %cst_19 : f32 to vector<1x8xf32>
    %43 = arith.mulf %41, %42 : vector<1x8xf32>
    %44 = arith.mulf %35, %35 : vector<8x8xf32>
    %cst_20 = arith.constant dense<0.000000e+00> : vector<8xf32>
    %45 = vector.multi_reduction <add>, %44, %cst_20 [0] : vector<8x8xf32> to vector<8xf32>
    %46 = vector.shape_cast %45 : vector<8xf32> to vector<1x8xf32>
    %cst_21 = arith.constant 1.250000e-01 : f32
    %47 = vector.broadcast %cst_21 : f32 to vector<1x8xf32>
    %48 = arith.mulf %46, %47 : vector<1x8xf32>
    %49 = arith.mulf %43, %43 : vector<1x8xf32>
    %50 = arith.subf %48, %49 : vector<1x8xf32>
    %cst_22 = arith.constant 0.000000e+00 : f32
    %51 = vector.broadcast %cst_22 : f32 to vector<1x8xf32>
    %52 = arith.maximumf %50, %51 : vector<1x8xf32>
    %cst_23 = arith.constant 9.99999974E-6 : f32
    %53 = vector.broadcast %cst_23 : f32 to vector<1x8xf32>
    %54 = arith.addf %52, %53 : vector<1x8xf32>
    %55 = math.rsqrt %54 : vector<1x8xf32>
    %56 = arith.mulf %38, %55 : vector<1x8xf32>
    %57 = arith.mulf %43, %56 : vector<1x8xf32>
    %58 = arith.subf %39, %57 : vector<1x8xf32>
    %59 = vector.broadcast %56 : vector<1x8xf32> to vector<8x8xf32>
    %60 = arith.mulf %35, %59 : vector<8x8xf32>
    %61 = vector.broadcast %58 : vector<1x8xf32> to vector<8x8xf32>
    %62 = arith.addf %60, %61 : vector<8x8xf32>
    %cst_24 = arith.constant 0.000000e+00 : f32
    %63 = vector.broadcast %cst_24 : f32 to vector<8x8xf32>
    %64 = arith.maximumf %62, %63 : vector<8x8xf32>
    %c0_25 = arith.constant 0 : index
    %c0_26 = arith.constant 0 : index
    %65 = vector.load %arg4[%c0_25, %c0_26] : memref<1x8xf32, #tpu.memory_space<vmem>>, vector<1x8xf32>
    %66 = vector.broadcast %65 : vector<1x8xf32> to vector<8x8xf32>
    %67 = arith.mulf %64, %66 : vector<8x8xf32>
    %cst_27 = arith.constant dense<0.000000e+00> : vector<8xf32>
    %68 = vector.multi_reduction <add>, %67, %cst_27 [1] : vector<8x8xf32> to vector<8xf32>
    %69 = vector.shape_cast %68 : vector<8xf32> to vector<8x1xf32>
    %c0_28 = arith.constant 0 : index
    %70 = memref.load %arg5[%c0_28] : memref<2xf32, #tpu.memory_space<smem>>
    %c1_29 = arith.constant 1 : index
    %71 = memref.load %arg5[%c1_29] : memref<2xf32, #tpu.memory_space<smem>>
    %cst_30 = arith.constant dense<0.000000e+00> : vector<1xf32>
    %72 = vector.multi_reduction <add>, %69, %cst_30 [0] : vector<8x1xf32> to vector<1xf32>
    %73 = vector.shape_cast %72 : vector<1xf32> to vector<1x1xf32>
    %cst_31 = arith.constant 1.250000e-01 : f32
    %74 = vector.broadcast %cst_31 : f32 to vector<1x1xf32>
    %75 = arith.mulf %73, %74 : vector<1x1xf32>
    %76 = arith.mulf %69, %69 : vector<8x1xf32>
    %cst_32 = arith.constant dense<0.000000e+00> : vector<1xf32>
    %77 = vector.multi_reduction <add>, %76, %cst_32 [0] : vector<8x1xf32> to vector<1xf32>
    %78 = vector.shape_cast %77 : vector<1xf32> to vector<1x1xf32>
    %cst_33 = arith.constant 1.250000e-01 : f32
    %79 = vector.broadcast %cst_33 : f32 to vector<1x1xf32>
    %80 = arith.mulf %78, %79 : vector<1x1xf32>
    %81 = arith.mulf %75, %75 : vector<1x1xf32>
    %82 = arith.subf %80, %81 : vector<1x1xf32>
    %cst_34 = arith.constant 0.000000e+00 : f32
    %83 = vector.broadcast %cst_34 : f32 to vector<1x1xf32>
    %84 = arith.maximumf %82, %83 : vector<1x1xf32>
    %cst_35 = arith.constant 9.99999974E-6 : f32
    %85 = vector.broadcast %cst_35 : f32 to vector<1x1xf32>
    %86 = arith.addf %84, %85 : vector<1x1xf32>
    %87 = math.rsqrt %86 : vector<1x1xf32>
    %88 = vector.broadcast %70 : f32 to vector<1x1xf32>
    %89 = arith.mulf %88, %87 : vector<1x1xf32>
    %90 = arith.mulf %75, %89 : vector<1x1xf32>
    %91 = vector.broadcast %71 : f32 to vector<1x1xf32>
    %92 = arith.subf %91, %90 : vector<1x1xf32>
    %93 = vector.broadcast %89 : vector<1x1xf32> to vector<8x1xf32>
    %94 = arith.mulf %69, %93 : vector<8x1xf32>
    %95 = vector.broadcast %92 : vector<1x1xf32> to vector<8x1xf32>
    %96 = arith.addf %94, %95 : vector<8x1xf32>
    %97 = math.tanh %96 : vector<8x1xf32>
    %c0_36 = arith.constant 0 : index
    %c0_37 = arith.constant 0 : index
    %98 = vector.load %arg6[%c0_36, %c0_37] : memref<8x1xf32, #tpu.memory_space<vmem>>, vector<8x1xf32>
    tpu.vector_store %arg6[%c0_36, %c0_37], %97 {strides = array<i32>} : memref<8x1xf32, #tpu.memory_space<vmem>>, vector<8x1xf32>,
    return
  }
}

</mosaic_0001>

<bundles_post_ra>
// kernel: decoder_cat_pallas.1
= control target key start
LH: loop header
LB: loop body
LE: loop exit
PB: predicated region body
PF: predicated region fallthrough
CT: control target
= control target key end

     0   :  { %11 = vsyncpa [#allocation3], 0  ;;  %s408_s0 = inlined_call_operand.vmem [shape: f32[8,32], index: 0, kind: input, shape index: {}]   ;;  %s409_s1 = inlined_call_operand.vmem [shape: bf16[32,16], index: 1, kind: input, shape index: {}]   ;;  %s410_s2 = inlined_call_operand.vmem [shape: bf16[16,8], index: 2, kind: input, shape index: {}]   ;;  %s411_s3 = inlined_call_operand.vmem [shape: f32[2,2,16], index: 3, kind: input, shape index: {}]   ;;  %s412_s4 = inlined_call_operand.vmem [shape: f32[1,8], index: 4, kind: input, shape index: {}]   ;;  %s413_s5 = inlined_call_operand.vmem [shape: f32[2], index: 5, kind: input, shape index: {}]   ;;  %s414_s6 = inlined_call_operand.vmem [shape: f32[8,1], index: 6, kind: output, shape index: {}]  }
   0x1   :  { %s28_s23 = sshll.u32 %s413_s5, 4  ;;  %s29_s23 = int_to_ptr.vmem [resolvable:$true] %s28_s23 }
   0x2   :  { %s323_s24 = scalar_lea.vmem %s29_s23, 16  ;;  %p328_p1 = scmp.lt.s32.totalorder %s29_s23, %s29_s23 }
   0x3   :  { %p324_p0 = scmp.ne.s32.totalorder %s29_s23, %s323_s24  ;;  %p329_p2 = scmp.lt.s32.totalorder %s323_s24, %s323_s24 }
   0x5   :  { %p330_p3 = por %p329_p2, %p328_p1 }
   0x7   :  { %p331_p4 = pnand %p330_p3, %p324_p0 }
   0x9   :  { %334 = shalt.err (!%p331_p4)
}
   0xa   :  { %s337_s25 = smov [#allocation2]  }
   0xb   :  { %31 = dma.vmem_to_smem %s29_s23, 16, %s337_s25, [#allocation3]  }
   0xc   :  { %335 = dma.done.wait [#allocation3], 16  }
   0xd   :  { %336 = vsyncadd [#allocation3], 4294967280 }
   0xe   :  { %35 = sfence }
   0xf   :  { %v312_v0 = vld [vmem:[%s409_s1] sm:$0xff]   ;;  %v338_v1 = vmov 0.0   ;;  %v313_v2 = vld [vmem:[%s409_s1 + $0x8] sm:$0xff]   ;;  %vm339_vm0 = vmmov 0   ;;  %vm55_vm1 = vcmask 261120   ;;  %vm100_vm2 = vcmask 130048  }
  0x10   :  { %295 = vmatprep.subr.bf16.mxu0 %v338_v1  ;;  %303 = vmatprep.subr.bf16.mxu1 %v338_v1  ;;  %v37_v3 = vld [vmem:[%s408_s0] sm:$0xff]  ;;  %v129_v31 = vlaneseq  ;;  %vm194_vm3 = vcmask 64512   ;;  %vm275_vm4 = vcmask 7168  }
  0x11   :  { %296 = vmatpush3.bf16.msra.mxu0 %v312_v0  ;;  %299 = vmatprep.mubr.msk.bf16.mxu0 %vm339_vm0, %v338_v1  ;;  %v38_v4 = vpack.c.bf16 %v37_v3, %v37_v3  ;;  %v314_v5 = vld [vmem:[%s410_s2] sm:$0xff]  }
  0x12   :  { %297 = vmatprep.subr.bf16.mxu0 %v338_v1  ;;  %305 = vmatprep.mubr.msk.bf16.mxu1 %vm339_vm0, %v338_v1  ;;  %v130_v32 = vshrl.u32 %v129_v31, 7  ;;  %v99_v33 = vld [vmem:[%s411_s3] sm:$0x3] }
  0x13   :  { %304 = vmatpush3.bf16.msra.mxu1 %v314_v5 }
  0x14   :  { %v131_v36 = vsub.s32 0, %v130_v32  ;;  %v136_v40 = vsub.s32 1, %v130_v32 }
  0x15   :  { %298 = vmatpush3.bf16.msra.mxu0 %v313_v2 }
  0x18   :  { %300 = vmatmul.mubr.msk.bf16.vlgmr.msra.gmra.mrb[0].mxu0 %vm55_vm1, %v38_v4 }
  0xeb   :  { %v93_v6 = vpop.f32.mrb[0].mxu0 }
  0xec   :  { %v101_v7 = vsel %vm100_vm2, %v93_v6, 0.0  ;;  %v109_v8 = vmul.f32 %v93_v6, %v93_v6  ;;  %v301_v9 = vpop.f32.mrb[1].mxu0 }
  0xed   :  { %v102_v10 = vrot.slane %v101_v7, 4  ;;  %v96_v11 = vpop.f32.mrb[2].mxu0 }
  0xee   :  { %v110_v12 = vsel %vm100_vm2, %v109_v8, 0.0  ;;  %v302_v13 = vpop.f32.mrb[3].mxu0  ;;  %v287_v8 = vld [vmem:[%s411_s3 + $0x2] sm:$0x3]  ;;  %s245_s3 = sld [smem:[#allocation2]] }
  0xef   :  { %v103_v14 = vadd.f32 %v102_v10, %v101_v7  ;;  %v111_v15 = vrot.slane %v110_v12, 4 }
  0xf1   :  { %v104_v16 = vrot.slane %v103_v14, 2  ;;  %v112_v17 = vadd.f32 %v111_v15, %v110_v12 }
  0xf3   :  { %v105_v18 = vadd.f32 %v104_v16, %v103_v14  ;;  %v113_v19 = vrot.slane %v112_v17, 2 }
  0xf5   :  { %v106_v20 = vrot.slane %v105_v18, 1  ;;  %v114_v21 = vadd.f32 %v113_v19, %v112_v17 }
  0xf7   :  { %v107_v22 = vadd.f32 %v106_v20, %v105_v18  ;;  %v115_v23 = vrot.slane %v114_v21, 1  ;;  %v288_v18 = vld [vmem:[%s412_s4] ss:$0 sm:$0xff]  ;;  %s289_s4 = sld [smem:[#allocation2 + $0x1]] }
  0xf9   :  { %v108_v24 = vmul.f32 0.125, %v107_v22  ;;  %v116_v25 = vadd.f32 %v115_v23, %v114_v21 }
  0xfb   :  { %v117_v26 = vmul.f32 0.125, %v116_v25  ;;  %v118_v27 = vmul.f32 %v108_v24, %v108_v24 }
  0xfd   :  { %v119_v28 = vsub.f32 %v117_v26, %v118_v27 }
  0xff   :  { %v120_v29 = vmax.f32 %v119_v28, 0.0 }
 0x101   :  { %v121_v30 = vadd.f32 1e-05, %v120_v29 }
 0x103   :  { %315 = vrsqrt.f32 %v121_v30 }
 0x10d   :  { %v316_v34 = vpop.eup %315 }
 0x10e   :  { %v123_v35 = vmul.f32 %v316_v34, %v99_v33 }
 0x110   :  { %v124_v37 = vmul.f32 %v123_v35, %v108_v24  ;;  %v132_v39 = vrot.slane %v123_v35, %v131_v36 }
 0x112   :  { %v126_v38 = vrot.slane %v124_v37, 7  ;;  %v133_v42 = vmul.f32 %v132_v39, %v93_v6 }
 0x114   :  { %v128_v41 = vsub.f32 %v99_v33, %v126_v38 }
 0x116   :  { %v137_v43 = vrot.slane %v128_v41, %v136_v40 }
 0x118   :  { %v138_v44 = vadd.f32 %v137_v43, %v133_v42  ;;  %v267_v42 = vstv %s245_s3 }
 0x11a   :  { %v139_v45 = vmax.f32 %v138_v44, 0.0 }
 0x11c   :  { %v140_v46 = vpack.c.bf16 %v139_v45, %v139_v45  ;;  %v270_v45 = vstv %s289_s4 }
 0x11e   :  { %306 = vmatmul.mubr.msk.bf16.vlgmr.msra.gmra.mrb[0].mxu1 %vm100_vm2, %v140_v46 }
 0x1f1   :  { %v186_v47 = vpop.f32.mrb[0].mxu1 }
 0x1f2   :  { %v203_v48 = vmul.f32 %v186_v47, %v186_v47  ;;  %v307_v49 = vpop.f32.mrb[1].mxu1  ;;  %v195_v50 = vsel %vm194_vm3, %v186_v47, 0.0 }
 0x1f3   :  { %v189_v51 = vpop.f32.mrb[2].mxu1  ;;  %v196_v52 = vrot.slane %v195_v50, 4 }
 0x1f4   :  { %v308_v53 = vpop.f32.mrb[3].mxu1  ;;  %v204_v54 = vsel %vm194_vm3, %v203_v48, 0.0 }
 0x1f5   :  { %v197_v55 = vadd.f32 %v196_v52, %v195_v50  ;;  %v205_v56 = vrot.slane %v204_v54, 4 }
 0x1f7   :  { %v198_v57 = vrot.slane %v197_v55, 2  ;;  %v206_v58 = vadd.f32 %v205_v56, %v204_v54 }
 0x1f9   :  { %v199_v59 = vadd.f32 %v198_v57, %v197_v55  ;;  %v207_v60 = vrot.slane %v206_v58, 2 }
 0x1fb   :  { %v200_v61 = vrot.slane %v199_v59, 1  ;;  %v208_v62 = vadd.f32 %v207_v60, %v206_v58 }
 0x1fd   :  { %v201_v63 = vadd.f32 %v200_v61, %v199_v59  ;;  %v209_v0 = vrot.slane %v208_v62, 1 }
 0x1ff   :  { %v202_v1 = vmul.f32 0.125, %v201_v63  ;;  %v210_v2 = vadd.f32 %v209_v0, %v208_v62 }
 0x201   :  { %v211_v3 = vmul.f32 0.125, %v210_v2  ;;  %v212_v4 = vmul.f32 %v202_v1, %v202_v1 }
 0x203   :  { %v213_v5 = vsub.f32 %v211_v3, %v212_v4 }
 0x205   :  { %v214_v6 = vmax.f32 %v213_v5, 0.0 }
 0x207   :  { %v215_v7 = vadd.f32 1e-05, %v214_v6 }
 0x209   :  { %317 = vrsqrt.f32 %v215_v7 }
 0x213   :  { %v318_v9 = vpop.eup %317 }
 0x214   :  { %v217_v10 = vmul.f32 %v318_v9, %v287_v8 }
 0x216   :  { %v218_v11 = vmul.f32 %v217_v10, %v202_v1  ;;  %v226_v13 = vrot.slane %v217_v10, %v131_v36 }
 0x218   :  { %v220_v12 = vrot.slane %v218_v11, 7  ;;  %v227_v15 = vmul.f32 %v226_v13, %v186_v47 }
 0x21a   :  { %v222_v14 = vsub.f32 %v287_v8, %v220_v12 }
 0x21c   :  { %v231_v16 = vrot.slane %v222_v14, %v136_v40 }
 0x21e   :  { %v232_v17 = vadd.f32 %v231_v16, %v227_v15 }
 0x220   :  { %v233_v19 = vmax.f32 %v232_v17, 0.0 }
 0x222   :  { %v241_v20 = vmul.f32 %v288_v18, %v233_v19 }
 0x224   :  { %v242_v21 = vsel %vm194_vm3, %v241_v20, 0.0 }
 0x225   :  { %243 = vadd.xlane.f32.xlu0 %v242_v21 }
 0x2b2   :  { %v244_v22 = vpop.xlane.xlu0 %243 }
 0x2b3   :  { %v247_v23 = vrot.slane %v244_v22, 4  ;;  %v254_v24 = vmul.f32 %v244_v22, %v244_v22 }
 0x2b5   :  { %v248_v25 = vadd.f32 %v247_v23, %v244_v22  ;;  %v255_v26 = vrot.slane %v254_v24, 4 }
 0x2b7   :  { %v249_v27 = vrot.slane %v248_v25, 2  ;;  %v256_v28 = vadd.f32 %v255_v26, %v254_v24 }
 0x2b9   :  { %v250_v29 = vadd.f32 %v249_v27, %v248_v25  ;;  %v257_v30 = vrot.slane %v256_v28, 2 }
 0x2bb   :  { %v251_v31 = vrot.slane %v250_v29, 1  ;;  %v258_v32 = vadd.f32 %v257_v30, %v256_v28 }
 0x2bd   :  { %v252_v33 = vadd.f32 %v251_v31, %v250_v29  ;;  %v259_v34 = vrot.slane %v258_v32, 1 }
 0x2bf   :  { %v253_v35 = vmul.f32 0.125, %v252_v33  ;;  %v260_v36 = vadd.f32 %v259_v34, %v258_v32 }
 0x2c1   :  { %v261_v37 = vmul.f32 0.125, %v260_v36  ;;  %v262_v38 = vmul.f32 %v253_v35, %v253_v35 }
 0x2c3   :  { %v263_v39 = vsub.f32 %v261_v37, %v262_v38 }
 0x2c5   :  { %v264_v40 = vmax.f32 %v263_v39, 0.0 }
 0x2c7   :  { %v265_v41 = vadd.f32 1e-05, %v264_v40 }
 0x2c9   :  { %319 = vrsqrt.f32 %v265_v41 }
 0x2d3   :  { %v320_v43 = vpop.eup %319 }
 0x2d4   :  { %v268_v44 = vmul.f32 %v320_v43, %v267_v42 }
 0x2d6   :  { %v269_v46 = vmul.f32 %v268_v44, %v253_v35  ;;  %v272_v48 = vmul.f32 %v268_v44, %v244_v22 }
 0x2d8   :  { %v271_v47 = vsub.f32 %v270_v45, %v269_v46 }
 0x2da   :  { %v273_v49 = vadd.f32 %v272_v48, %v271_v47 }
 0x2dc   :  { %321 = vtanh.f32 %v273_v49 }
 0x2e6   :  { %v322_v50 = vpop.eup %321 }
 0x2e7   :  { %276 = vst.msk [vmem:[%s414_s6] sm:$0xff] %vm275_vm4, %v322_v50 }
 0x2e8   :  { %281 = vsyncpa [#allocation3], 1 }

</bundles_post_ra>
